<compile_context>
chip_gen: v7x
topology: tpu7x:2x2x1
jax: 0.10.0
libtpu: 0.0.40
codegen_flags: <defaults>
</compile_context>

<pallas_src>
import jax
import jax.numpy as jnp
from jax.experimental import pallas as pl
from jax.experimental.pallas import tpu as pltpu


def time_embedding_kernel(x_ref, w1_ref, b1_ref, w2_ref, b2_ref, out_ref):
    # --- Linear 1 (full): bf16 x bf16 -> f32 on the MXU ---------------------
    x_bf = x_ref[...].astype(jnp.bfloat16)                # cast activations, not weights
    h = jnp.dot(x_bf, w1_ref[...], preferred_element_type=jnp.float32) + b1_ref[...]

    # --- SiLU in f32: h * sigmoid(h) -----------------------------------------
    # Clamp the exponent so exp(-h) never overflows for very negative h
    # (silu -> 0 limit).  exp + approx reciprocal both run on the EUP.
    z = jnp.exp(jnp.minimum(-h, 30.0))
    h = h * pl.reciprocal(1.0 + z, approx=True)

    # --- Linear 2 (column tile): bf16 x bf16 -> f32 --------------------------
    out = jnp.dot(h.astype(jnp.bfloat16), w2_ref[...],
                  preferred_element_type=jnp.float32) + b2_ref[...]
    out_ref[...] = out.astype(out_ref.dtype)


def prepare_time_embedding_params(w1, b1, w2, b2):
    """One-time (model-init) parameter prep: weights -> bf16, biases -> f32.

    Do NOT call this per forward pass -- the whole point is that the weights
    already live in HBM as bf16 so the kernel's weight DMA is halved.
    """
    return (w1.astype(jnp.bfloat16), b1.astype(jnp.float32),
            w2.astype(jnp.bfloat16), b2.astype(jnp.float32))


def _tensorcores_per_chip():
    """2 on v7x, 1 on v5e / v6e (best-effort; defaults to 1)."""
    try:
        kind = jax.devices()[0].device_kind.lower()
    except Exception:
        return 1
    return 2 if ("v7" in kind or "7x" in kind) else 1


def _pick_col_tile(n_hidden):
    """Column tile for w2 / b2 / out.

    Split only on chips with 2 TensorCores (v7x): each TC then DMAs/computes
    half of the dominant w2 transfer.  On 1-TC chips a grid split is just a
    serial loop (per-step overhead + duplicated SiLU), so use a single program.
    """
    if _tensorcores_per_chip() < 2:
        return n_hidden
    if n_hidden % 256 == 0:
        return n_hidden // 2
    if n_hidden % 128 == 0 and n_hidden > 128:
        # Lane-aligned "round half up" split; last tile may be ragged
        # (Pallas masks the out-of-bounds part).
        return ((n_hidden // 128 + 1) // 2) * 128
    return n_hidden


def time_embedding(x, w1, b1, w2, b2):
    """x: (B, n_embd) f32; w1: (n_embd, 4n) bf16; b1: (1, 4n) f32;
    w2: (4n, 4n) bf16; b2: (1, 4n) f32.

    Weights should be stored/passed as bf16 (convert once at init via
    prepare_time_embedding_params); a fallback cast is applied here only if
    they are not (suboptimal: adds a per-call HBM round trip).
    """
    B, n_embd = x.shape
    n_hidden = w1.shape[1]
    assert w1.shape == (n_embd, n_hidden)
    assert b1.shape == (1, n_hidden)
    assert w2.shape == (n_hidden, n_hidden)
    assert b2.shape == (1, n_hidden)

    # Fallback only -- the intended path is bf16 weights from model init.
    if w1.dtype != jnp.bfloat16:
        w1 = w1.astype(jnp.bfloat16)
    if w2.dtype != jnp.bfloat16:
        w2 = w2.astype(jnp.bfloat16)
    b1 = b1.astype(jnp.float32)
    b2 = b2.astype(jnp.float32)

    # Pad batch to a full sublane group (8 rows) -> unmasked stores on the
    # output block.  Padded rows are zeros and are sliced off below.
    B_orig = B
    if B % 8 != 0:
        pad = 8 - (B % 8)
        x = jnp.pad(x, ((0, pad), (0, 0)))
        B = B + pad

    tn = _pick_col_tile(n_hidden)
    grid = (pl.cdiv(n_hidden, tn),)

    # Advisory cost: lets XLA overlap this DMA-bound call with neighbors.
    bytes_accessed = (
        x.size * 4                          # x (f32)
        + w1.size * 2 + b1.size * 4         # w1 (bf16) + b1 (f32)
        + w2.size * 2 + b2.size * 4         # w2 (bf16) + b2 (f32)
        + B * n_hidden * 4                  # output (f32)
    )
    cost = pl.CostEstimate(
        flops=2 * B * (n_embd * n_hidden + n_hidden * n_hidden),
        transcendentals=B * n_hidden,
        bytes_accessed=bytes_accessed,
    )

    out = pl.pallas_call(
        time_embedding_kernel,
        out_shape=jax.ShapeDtypeStruct((B, n_hidden), x.dtype),
        grid_spec=pltpu.PrefetchScalarGridSpec(
            num_scalar_prefetch=0,
            grid=grid,
            in_specs=[
                pl.BlockSpec((B, n_embd), lambda j: (0, 0)),         # x (full)
                pl.BlockSpec((n_embd, n_hidden), lambda j: (0, 0)),  # w1 (full, bf16)
                pl.BlockSpec((1, n_hidden), lambda j: (0, 0)),       # b1 (full)
                pl.BlockSpec((n_hidden, tn), lambda j: (0, j)),      # w2 column tile (bf16)
                pl.BlockSpec((1, tn), lambda j: (0, j)),             # b2 column tile
            ],
            out_specs=pl.BlockSpec((B, tn), lambda j: (0, j)),
        ),
        compiler_params=pltpu.CompilerParams(
            dimension_semantics=("parallel",),
        ),
        cost_estimate=cost,
    )(x, w1, b1, w2, b2)

    if B != B_orig:
        out = out[:B_orig]
    return out


def reference_kernel_numerics(x, w1_bf, b1, w2_bf, b2):
    """Pure-JAX reference mimicking the kernel's rounding scheme
    (bf16 operands into f32-accumulated matmuls, exact sigmoid)."""
    xr = x.astype(jnp.bfloat16).astype(jnp.float32)
    h = xr @ w1_bf.astype(jnp.float32) + b1
    h = h * jax.nn.sigmoid(h)
    hr = h.astype(jnp.bfloat16).astype(jnp.float32)
    return hr @ w2_bf.astype(jnp.float32) + b2


if __name__ == "__main__":
    # Small shapes consistent with the module: n_embd=32 -> hidden=128, batch=2.
    B, n_embd = 2, 32
    n_hidden = 4 * n_embd

    key = jax.random.PRNGKey(0)
    kx, kw1, kb1, kw2, kb2 = jax.random.split(key, 5)

    x = jax.random.normal(kx, (B, n_embd), dtype=jnp.float32)
    # Deterministic synthetic params (scaled like a typical Linear init).
    w1 = jax.random.normal(kw1, (n_embd, n_hidden), dtype=jnp.float32) * (1.0 / n_embd ** 0.5)
    b1 = jax.random.normal(kb1, (1, n_hidden), dtype=jnp.float32) * 0.01
    w2 = jax.random.normal(kw2, (n_hidden, n_hidden), dtype=jnp.float32) * (1.0 / n_hidden ** 0.5)
    b2 = jax.random.normal(kb2, (1, n_hidden), dtype=jnp.float32) * 0.01

    # One-time (init) conversion to bf16 -- NOT done per forward call.
    w1_bf, b1_p, w2_bf, b2_p = prepare_time_embedding_params(w1, b1, w2, b2)

    out = jax.block_until_ready(time_embedding(x, w1_bf, b1_p, w2_bf, b2_p))

    ref = reference_kernel_numerics(x, w1_bf, b1_p, w2_bf, b2_p)

    assert out.shape == (B, n_hidden), out.shape
    # Remaining differences: MXU accumulation order and the EUP approximate
    # reciprocal inside the sigmoid (~1e-3 rel, intentional).
    assert jnp.allclose(out, ref, atol=1e-2, rtol=1e-2), float(jnp.max(jnp.abs(out - ref)))

    print("KERNEL_OK")
</pallas_src>

<mosaic_0001>
module attributes {stable_mosaic.version = 11 : i64} {
  func.func @time_embedding_kernel(%arg0: i32, %arg1: memref<8x32xf32, #tpu.memory_space<vmem>>, %arg2: memref<32x128xbf16, #tpu.memory_space<vmem>>, %arg3: memref<1x128xf32, #tpu.memory_space<vmem>>, %arg4: memref<128x128xbf16, #tpu.memory_space<vmem>>, %arg5: memref<1x128xf32, #tpu.memory_space<vmem>>, %arg6: memref<8x128xf32, #tpu.memory_space<vmem>>) attributes {dimension_semantics = [#tpu.dimension_semantics<parallel>], iteration_bounds = array<i64: 1>, scalar_prefetch = 0 : i64, scratch_operands = 0 : i64, tpu.core_type = #tpu.core_type<tc>, window_params = [{pipeline_mode = #tpu.pipeline_mode<synchronous>, transform_indices = @transform_0, window_bounds = array<i64: 8, 32>}, {pipeline_mode = #tpu.pipeline_mode<synchronous>, transform_indices = @transform_1, window_bounds = array<i64: 32, 128>}, {pipeline_mode = #tpu.pipeline_mode<synchronous>, transform_indices = @transform_2, window_bounds = array<i64: 1, 128>}, {transform_indices = @transform_3, window_bounds = array<i64: 128, 128>}, {transform_indices = @transform_4, window_bounds = array<i64: 1, 128>}, {transform_indices = @transform_5, window_bounds = array<i64: 8, 128>}]} {
    %c0 = arith.constant 0 : index
    %c0_0 = arith.constant 0 : index
    %0 = vector.load %arg1[%c0, %c0_0] : memref<8x32xf32, #tpu.memory_space<vmem>>, vector<8x32xf32>
    %1 = arith.truncf %0 : vector<8x32xf32> to vector<8x32xbf16>
    %c0_1 = arith.constant 0 : index
    %c0_2 = arith.constant 0 : index
    %2 = vector.load %arg2[%c0_1, %c0_2] : memref<32x128xbf16, #tpu.memory_space<vmem>>, vector<32x128xbf16>
    %cst = arith.constant dense<0.000000e+00> : vector<8x128xf32>
    %3 = tpu.matmul %1, %2, %cst {dimension_numbers = #tpu.dot_dimension_numbers<[1], [0], [0], [1], [0, 0, 1, 1], [], []>} : vector<8x32xbf16>, vector<32x128xbf16>, vector<8x128xf32> -> vector<8x128xf32>
    %c0_3 = arith.constant 0 : index
    %c0_4 = arith.constant 0 : index
    %4 = vector.load %arg3[%c0_3, %c0_4] : memref<1x128xf32, #tpu.memory_space<vmem>>, vector<1x128xf32>
    %5 = vector.broadcast %4 : vector<1x128xf32> to vector<8x128xf32>
    %6 = arith.addf %3, %5 : vector<8x128xf32>
    %cst_5 = arith.constant 0.000000e+00 : f32
    %7 = vector.broadcast %cst_5 : f32 to vector<8x128xf32>
    %8 = arith.subf %7, %6 : vector<8x128xf32>
    %cst_6 = arith.constant 3.000000e+01 : f32
    %9 = vector.broadcast %cst_6 : f32 to vector<8x128xf32>
    %10 = arith.minimumf %8, %9 : vector<8x128xf32>
    %11 = math.exp %10 : vector<8x128xf32>
    %cst_7 = arith.constant 1.000000e+00 : f32
    %12 = vector.broadcast %cst_7 : f32 to vector<8x128xf32>
    %13 = arith.addf %12, %11 : vector<8x128xf32>
    %14 = tpu.reciprocal %13 {approx = true} : vector<8x128xf32> -> vector<8x128xf32>
    %15 = arith.mulf %6, %14 : vector<8x128xf32>
    %16 = arith.truncf %15 : vector<8x128xf32> to vector<8x128xbf16>
    %c0_8 = arith.constant 0 : index
    %c0_9 = arith.constant 0 : index
    %17 = vector.load %arg4[%c0_8, %c0_9] : memref<128x128xbf16, #tpu.memory_space<vmem>>, vector<128x128xbf16>
    %cst_10 = arith.constant dense<0.000000e+00> : vector<8x128xf32>
    %18 = tpu.matmul %16, %17, %cst_10 {dimension_numbers = #tpu.dot_dimension_numbers<[1], [0], [0], [1], [0, 0, 1, 1], [], []>} : vector<8x128xbf16>, vector<128x128xbf16>, vector<8x128xf32> -> vector<8x128xf32>
    %c0_11 = arith.constant 0 : index
    %c0_12 = arith.constant 0 : index
    %19 = vector.load %arg5[%c0_11, %c0_12] : memref<1x128xf32, #tpu.memory_space<vmem>>, vector<1x128xf32>
    %20 = vector.broadcast %19 : vector<1x128xf32> to vector<8x128xf32>
    %21 = arith.addf %18, %20 : vector<8x128xf32>
    %c0_13 = arith.constant 0 : index
    %c0_14 = arith.constant 0 : index
    %22 = vector.load %arg6[%c0_13, %c0_14] : memref<8x128xf32, #tpu.memory_space<vmem>>, vector<8x128xf32>
    tpu.vector_store %arg6[%c0_13, %c0_14], %21 {strides = array<i32>} : memref<8x128xf32, #tpu.memory_space<vmem>>, vector<8x128xf32>,
    return
  }
  func.func @transform_0(%arg0: i32) -> (i32, i32) {
    %c0_i32 = arith.constant 0 : i32
    %c0_i32_0 = arith.constant 0 : i32
    %c0_i32_1 = arith.constant 0 : i32
    return %c0_i32, %c0_i32_0 : i32, i32
  }
  func.func @transform_1(%arg0: i32) -> (i32, i32) {
    %c0_i32 = arith.constant 0 : i32
    %c0_i32_0 = arith.constant 0 : i32
    %c0_i32_1 = arith.constant 0 : i32
    return %c0_i32, %c0_i32_0 : i32, i32
  }
  func.func @transform_2(%arg0: i32) -> (i32, i32) {
    %c0_i32 = arith.constant 0 : i32
    %c0_i32_0 = arith.constant 0 : i32
    %c0_i32_1 = arith.constant 0 : i32
    return %c0_i32, %c0_i32_0 : i32, i32
  }
  func.func @transform_3(%arg0: i32) -> (i32, i32) {
    %c0_i32 = arith.constant 0 : i32
    %c0_i32_0 = arith.constant 0 : i32
    return %c0_i32, %arg0 : i32, i32
  }
  func.func @transform_4(%arg0: i32) -> (i32, i32) {
    %c0_i32 = arith.constant 0 : i32
    %c0_i32_0 = arith.constant 0 : i32
    return %c0_i32, %arg0 : i32, i32
  }
  func.func @transform_5(%arg0: i32) -> (i32, i32) {
    %c0_i32 = arith.constant 0 : i32
    %c0_i32_0 = arith.constant 0 : i32
    return %c0_i32, %arg0 : i32, i32
  }
}

</mosaic_0001>

<bundles_post_ra>
// kernel: tpu_custom_call.1
= control target key start
LH: loop header
LB: loop body
LE: loop exit
PB: predicated region body
PF: predicated region fallthrough
CT: control target
= control target key end

     0   :  { %10 = vsyncpa [#allocation3], 0  ;;  %s533_s0 = inlined_call_operand.hbm [shape: f32[8,32], index: 0, kind: input, shape index: {}]   ;;  %s534_s1 = inlined_call_operand.hbm [shape: bf16[32,128], index: 1, kind: input, shape index: {}]   ;;  %s535_s2 = inlined_call_operand.vmem [shape: f32[1,128], index: 2, kind: input, shape index: {}]   ;;  %s536_s3 = inlined_call_operand.hbm [shape: bf16[128,128], index: 3, kind: input, shape index: {}]   ;;  %s537_s4 = inlined_call_operand.vmem [shape: f32[1,128], index: 4, kind: input, shape index: {}]   ;;  %s538_s5 = inlined_call_operand.hbm [shape: f32[8,128], index: 5, kind: output, shape index: {}]  }
   0x1   :  { %11 = vsyncpa [#allocation6], 0 }
   0x2   :  { %12 = vsyncpa [#allocation4], 0  ;;  %s435_s18 = smov [#allocation5]   ;;  %s341_s22 = scalar_lea.hbm %s534_s1, 256 }
   0x3   :  { %s28_s19 = sshll.u32 %s435_s18, 4  ;;  %p342_p0 = scmp.ne.s32.totalorder %s534_s1, %s341_s22  ;;  %s29_s19 = int_to_ptr.vmem [resolvable:$true] %s28_s19 }
   0x4   :  { %p345_p1 = scmp.lt.u32.totalorder %s341_s22, %s534_s1 }
   0x6   :  { %p347_p2 = pnand %p345_p1, %p342_p0 }
   0x8   :  { %350 = shalt.err (!%p347_p2)
}
   0x9   :  { %s351_s27 = scalar_lea.vmem %s29_s19, 256  ;;  %p356_p4 = scmp.lt.s32.totalorder %s29_s19, %s29_s19 }
   0xa   :  { %p352_p3 = scmp.ne.s32.totalorder %s29_s19, %s351_s27  ;;  %p357_p5 = scmp.lt.s32.totalorder %s351_s27, %s351_s27 }
   0xc   :  { %p358_p6 = por %p357_p5, %p356_p4 }
   0xe   :  { %p359_p7 = pnand %p358_p6, %p352_p3 }
  0x10   :  { %362 = shalt.err (!%p359_p7)
}
  0x11   :  { %s436_s28 = smov 64   ;;  %s437_s29 = smov 4  }
  0x12   :  { %34 = dma.hbm_to_vmem [thread:$0]  %s534_s1, 256, %s29_s19, [#allocation6], %s436_s28, %s436_s28, %s437_s29  }
  0x13   :  { %s438_s7 = smov [#allocation2]   ;;  %s439_s9 = smov [#allocation7]  }
  0x14   :  { %s19_s8 = sshll.u32 %s438_s7, 4  ;;  %s42_s10 = sshll.u32 %s439_s9, 4  ;;  %s20_s8 = int_to_ptr.vmem [resolvable:$true] %s19_s8  ;;  %s43_s10 = int_to_ptr.vmem [resolvable:$true] %s42_s10 }
  0x15   :  { %s363_s13 = scalar_lea.hbm %s533_s0, 128 }
  0x16   :  { %p364_p8 = scmp.ne.s32.totalorder %s533_s0, %s363_s13  ;;  %p367_p9 = scmp.lt.u32.totalorder %s363_s13, %s533_s0 }
  0x18   :  { %p369_p10 = pnand %p367_p9, %p364_p8 }
  0x1a   :  { %372 = shalt.err (!%p369_p10)
}
  0x1b   :  { %s373_s1 = scalar_lea.vmem %s20_s8, 128  ;;  %p378_p12 = scmp.lt.s32.totalorder %s20_s8, %s20_s8 }
  0x1c   :  { %p374_p11 = scmp.ne.s32.totalorder %s20_s8, %s373_s1  ;;  %p379_p13 = scmp.lt.s32.totalorder %s373_s1, %s373_s1 }
  0x1e   :  { %p380_p0 = por %p379_p13, %p378_p12 }
  0x20   :  { %p381_p1 = pnand %p380_p0, %p374_p11 }
  0x22   :  { %384 = shalt.err (!%p381_p1)
}
  0x23   :  { %22 = dma.hbm_to_vmem [thread:$0]  %s533_s0, 128, %s20_s8, [#allocation3]  }
  0x24   :  { %s385_s22 = scalar_lea.hbm %s536_s3, 1024 }
  0x25   :  { %p386_p2 = scmp.ne.s32.totalorder %s536_s3, %s385_s22  ;;  %p389_p3 = scmp.lt.u32.totalorder %s385_s22, %s536_s3 }
  0x27   :  { %p391_p4 = pnand %p389_p3, %p386_p2 }
  0x29   :  { %394 = shalt.err (!%p391_p4)
}
  0x2a   :  { %s395_s27 = scalar_lea.vmem %s43_s10, 1024  ;;  %p400_p6 = scmp.lt.s32.totalorder %s43_s10, %s43_s10 }
  0x2b   :  { %p396_p5 = scmp.ne.s32.totalorder %s43_s10, %s395_s27  ;;  %p401_p7 = scmp.lt.s32.totalorder %s395_s27, %s395_s27 }
  0x2d   :  { %p402_p8 = por %p401_p7, %p400_p6 }
  0x2f   :  { %p403_p9 = pnand %p402_p8, %p396_p5 }
  0x31   :  { %406 = shalt.err (!%p403_p9)
}
  0x32   :  { %48 = dma.hbm_to_vmem [thread:$0]  %s536_s3, 1024, %s43_s10, [#allocation6], %s436_s28, %s436_s28, %s437_s29  }
  0x33   :  { %429 = dma.done.wait [#allocation3], 128  }
  0x34   :  { %430 = vsyncadd [#allocation3], 4294967168 }
  0x35   :  { %431 = dma.done.wait [#allocation6], 1280  }
  0x36   :  { %432 = vsyncadd [#allocation6], 4294966016  ;;  %v440_v0 = vmov 0.0   ;;  %vm441_vm0 = vmmov 0   ;;  %v327_v1 = vld [vmem:[#allocation5] sm:$0xff]   ;;  %v328_v2 = vld [vmem:[#allocation5 + $0x8] sm:$0xff]  }
  0x37   :  { %291 = vmatprep.subr.bf16.mxu0 %v440_v0  ;;  %295 = vmatprep.mubr.msk.bf16.mxu0 %vm441_vm0, %v440_v0  ;;  %v61_v3 = vld [vmem:[#allocation2] sm:$0xff]  ;;  %vm86_vm1 = vcmask 261120   ;;  %v329_v5 = vld [vmem:[#allocation7] sm:$0xff]   ;;  %v331_v7 = vld [vmem:[#allocation7 + $0x10] sm:$0xff]  }
  0x38   :  { %299 = vmatprep.subr.bf16.mxu1 %v440_v0  ;;  %315 = vmatprep.mubr.msk.bf16.mxu1 %vm441_vm0, %v440_v0  ;;  %v62_v4 = vpack.c.bf16 %v61_v3, %v61_v3  ;;  %v330_v6 = vld [vmem:[#allocation7 + $0x8] sm:$0xff]   ;;  %v332_v8 = vld [vmem:[#allocation7 + $0x18] sm:$0xff]   ;;  %v333_v9 = vld [vmem:[#allocation7 + $0x20] sm:$0xff]  }
  0x39   :  { %292 = vmatpush3.bf16.msra.mxu0 %v327_v1  ;;  %300 = vmatpush3.bf16.msra.mxu1 %v329_v5  ;;  %v334_v10 = vld [vmem:[#allocation7 + $0x28] sm:$0xff]   ;;  %v335_v11 = vld [vmem:[#allocation7 + $0x30] sm:$0xff]   ;;  %v336_v12 = vld [vmem:[#allocation7 + $0x38] sm:$0xff]  }
  0x3a   :  { %293 = vmatprep.subr.bf16.mxu0 %v440_v0  ;;  %301 = vmatprep.subr.bf16.mxu1 %v440_v0  ;;  %v266_v13 = vld [vmem:[%s535_s2] ss:$0 sm:$0xff]  ;;  %s442_s2 = smov [#allocation8]  }
  0x3b   :  { %v270_v27 = vld [vmem:[%s537_s4] ss:$0 sm:$0xff]  ;;  %s256_s7 = sshll.u32 %s442_s2, 4  ;;  %s257_s7 = int_to_ptr.vmem [resolvable:$true] %s256_s7 }
  0x3c   :  { %s407_s8 = scalar_lea.vmem %s257_s7, 128  ;;  %p412_p11 = scmp.lt.s32.totalorder %s257_s7, %s257_s7 }
  0x3d   :  { %294 = vmatpush3.bf16.msra.mxu0 %v328_v2  ;;  %302 = vmatpush3.bf16.msra.mxu1 %v330_v6  ;;  %p408_p10 = scmp.ne.s32.totalorder %s257_s7, %s407_s8  ;;  %p413_p12 = scmp.lt.s32.totalorder %s407_s8, %s407_s8 }
  0x3e   :  { %303 = vmatprep.subr.bf16.mxu1 %v440_v0 }
  0x3f   :  { %p414_p13 = por %p413_p12, %p412_p11 }
  0x40   :  { %296 = vmatmul.mubr.msk.bf16.vlgmr.msra.gmra.mrb[0].mxu0 %vm86_vm1, %v62_v4 }
  0x41   :  { %304 = vmatpush3.bf16.msra.mxu1 %v331_v7  ;;  %p415_p0 = pnand %p414_p13, %p408_p10 }
  0x42   :  { %305 = vmatprep.subr.bf16.mxu1 %v440_v0 }
  0x45   :  { %306 = vmatpush3.bf16.msra.mxu1 %v332_v8 }
  0x46   :  { %307 = vmatprep.subr.bf16.mxu1 %v440_v0 }
  0x49   :  { %308 = vmatpush3.bf16.msra.mxu1 %v333_v9 }
  0x4a   :  { %309 = vmatprep.subr.bf16.mxu1 %v440_v0 }
  0x4d   :  { %310 = vmatpush3.bf16.msra.mxu1 %v334_v10 }
  0x4e   :  { %311 = vmatprep.subr.bf16.mxu1 %v440_v0 }
  0x51   :  { %312 = vmatpush3.bf16.msra.mxu1 %v335_v11 }
  0x52   :  { %313 = vmatprep.subr.bf16.mxu1 %v440_v0 }
  0x55   :  { %314 = vmatpush3.bf16.msra.mxu1 %v336_v12 }
 0x113   :  { %v124_v14 = vpop.f32.mrb[0].mxu0 }
 0x114   :  { %v125_v15 = vadd.f32 %v266_v13, %v124_v14  ;;  %v297_v16 = vpop.f32.mrb[1].mxu0 }
 0x115   :  { %v127_v17 = vpop.f32.mrb[2].mxu0 }
 0x116   :  { %v130_v18 = vsub.f32 0.0, %v125_v15  ;;  %v298_v19 = vpop.f32.mrb[3].mxu0 }
 0x118   :  { %v131_v20 = vmin.f32 %v130_v18, 30.0 }
 0x11a   :  { %v132_v21 = vmul.f32 1.442695, %v131_v20 }
 0x11c   :  { %337 = vpow2.f32 %v132_v21 }
 0x126   :  { %v338_v22 = vpop.eup %337 }
 0x127   :  { %v134_v23 = vadd.f32 1.0, %v338_v22 }
 0x129   :  { %339 = vrcp.f32 %v134_v23 }
 0x133   :  { %v340_v24 = vpop.eup %339 }
 0x134   :  { %v136_v25 = vmul.f32 %v340_v24, %v125_v15 }
 0x136   :  { %v137_v26 = vpack.c.bf16 %v136_v25, %v136_v25 }
 0x138   :  { %316 = vmatmul.mubr.bf16.vlgmr.msra.gmra.mrb[0].mxu1 %v137_v26 }
 0x20b   :  { %v243_v28 = vpop.f32.mrb[0].mxu1 }
 0x20c   :  { %v244_v29 = vadd.f32 %v270_v27, %v243_v28  ;;  %v317_v30 = vpop.f32.mrb[1].mxu1 }
 0x20d   :  { %v246_v31 = vpop.f32.mrb[2].mxu1 }
 0x20e   :  { %249 = vst [vmem:[#allocation8] sm:$0xff] %v244_v29  ;;  %v318_v32 = vpop.f32.mrb[3].mxu1 }
 0x20f   :  { %418 = shalt.err (!%p415_p0)
}
 0x210   :  { %s419_s4 = scalar_lea.hbm %s538_s5, 128 }
 0x211   :  { %p420_p1 = scmp.ne.s32.totalorder %s538_s5, %s419_s4  ;;  %p423_p2 = scmp.lt.u32.totalorder %s419_s4, %s538_s5 }
 0x213   :  { %p425_p3 = pnand %p423_p2, %p420_p1 }
 0x215   :  { %428 = shalt.err (!%p425_p3)
}
 0x216   :  { %259 = dma.vmem_to_hbm [thread:$0]  %s257_s7, 128, %s538_s5, [#allocation4]  }
 0x217   :  { %433 = dma.done.wait [#allocation4], 128  }
 0x218   :  { %434 = vsyncadd [#allocation4], 4294967168 }
 0x219   :  { %263 = vsyncpa [#allocation3], 1 }
 0x21a   :  { %264 = vsyncpa [#allocation6], 1 }
 0x21b   :  { %265 = vsyncpa [#allocation4], 1 }

</bundles_post_ra>
